<compile_context>
chip_gen: v6e
topology: v6e:2x2x1
jax: 0.10.0
libtpu: 0.0.40
codegen_flags: <defaults>
</compile_context>

<pallas_src>
import functools

import jax
import jax.numpy as jnp
from jax.experimental import pallas as pl
from jax.experimental.pallas import tpu as pltpu


def _cheb_conv_fused_kernel(aT_ref, xr_ref, theta_bd_ref, o_ref, *, K, N):
    """Per-batch fused Chebyshev graph convolution.

    aT_ref:       (1, K*N, N)       stacked (cheb_k * satt)^T operators (t-invariant)
    xr_ref:       (1, N, T*F)       all T graph signals of this batch, lane-packed
    theta_bd_ref: (K, T*F, T*Fout)  per-k block-diagonal Theta (T copies of (F, Fout))
    o_ref:        (1, N, T*Fout)    lane-dense output slab
    """
    # Stage 1: one MXU matmul fused over K (rows) and T (lanes).
    #   R[k*N + i, t*F + f] = sum_j (cheb_k * satt)[j, i] * x[t, j, f]
    r = jnp.dot(aT_ref[0], xr_ref[0], preferred_element_type=jnp.float32)  # (K*N, T*F)

    # Stage 2: per-k block-diagonal Theta handles every timestep in one 2-D
    # matmul; accumulate over k (small static constant -> unrolled).
    acc = jnp.dot(r[0:N, :], theta_bd_ref[0],
                  preferred_element_type=jnp.float32)                      # (N, T*Fout)
    for kk in range(1, K):
        acc = acc + jnp.dot(r[kk * N:(kk + 1) * N, :], theta_bd_ref[kk],
                            preferred_element_type=jnp.float32)

    o_ref[0] = jnp.maximum(acc, 0.0).astype(o_ref.dtype)


def cheb_conv_with_sat_static(x, satt, cheb, theta):
    """Pallas TPU implementation of cheb_conv_with_SAt_static.forward.

    x:     (B, T, N, F)    float32
    satt:  (B, N, N)       float32
    cheb:  (B, K, N, N)    float32   (batched cheb_polynomials)
    theta: (K, F, Fout)    float32
    returns (B, T, N, Fout)
    """
    B, T, N, F = x.shape
    K, F2, Fout = theta.shape
    assert F2 == F
    assert satt.shape == (B, N, N)
    assert cheb.shape == (B, K, N, N)

    # ---- one-time, t-invariant preprocessing (hoisted out of the kernel) ----
    # A_k = cheb_k * satt, transposed and stacked over k:  (B, K*N, N)
    a_t = (cheb * satt[:, None, :, :]).transpose(0, 1, 3, 2).reshape(B, K * N, N)
    # Graph signals rearranged so one batch presents all timesteps as a single
    # lane-packed matmul RHS:  xr[b, j, t*F + f] = x[b, t, j, f]
    xr = jnp.transpose(x, (0, 2, 1, 3)).reshape(B, N, T * F)
    # Block-diagonal Theta so one matmul per k covers all T timesteps:
    #   theta_bd[k, t*F+f, t'*Fout+o] = Theta[k, f, o] * (t == t')
    eye_t = jnp.eye(T, dtype=theta.dtype)
    theta_bd = jnp.einsum("tq,kfo->ktfqo", eye_t, theta).reshape(K, T * F, T * Fout)

    kernel = functools.partial(_cheb_conv_fused_kernel, K=K, N=N)

    out_slab = pl.pallas_call(
        kernel,
        out_shape=jax.ShapeDtypeStruct((B, N, T * Fout), x.dtype),
        grid_spec=pltpu.PrefetchScalarGridSpec(
            num_scalar_prefetch=0,
            grid=(B,),
            in_specs=[
                # stacked transposed operators for batch b
                pl.BlockSpec((1, K * N, N), lambda b: (b, 0, 0)),
                # all T graph signals for batch b
                pl.BlockSpec((1, N, T * F), lambda b: (b, 0, 0)),
                # shared block-diagonal Theta (grid-invariant)
                pl.BlockSpec((K, T * F, T * Fout), lambda b: (0, 0, 0)),
            ],
            out_specs=pl.BlockSpec((1, N, T * Fout), lambda b: (b, 0, 0)),
        ),
        compiler_params=pltpu.CompilerParams(
            dimension_semantics=("parallel",)),
    )(a_t, xr, theta_bd)

    # (B, N, T*Fout) -> (B, T, N, Fout)
    return jnp.transpose(out_slab.reshape(B, N, T, Fout), (0, 2, 1, 3))


def xavier_uniform(key, shape, gain=1.414, dtype=jnp.float32):
    # matches torch.nn.init.xavier_uniform_ for a (K, fan_in, fan_out) tensor
    fan_in, fan_out = shape[-2], shape[-1]
    bound = gain * (6.0 / (fan_in + fan_out)) ** 0.5
    return jax.random.uniform(key, shape, dtype=dtype, minval=-bound, maxval=bound)


def _reference(x, satt, cheb, theta):
    # pure-JAX reference of the PyTorch forward
    t_k_with_at = cheb * satt[:, None, :, :]                     # (B, K, N, N)
    rhs = jnp.einsum("bkji,btjf->bktif", t_k_with_at, x)         # (B, K, T, N, F)
    out = jnp.einsum("bktif,kfo->btio", rhs, theta)              # (B, T, N, Fout)
    return jax.nn.relu(out)


if __name__ == "__main__":
    # Small shapes consistent with the module's forward.
    B, T, N, F = 2, 8, 16, 4
    K, Fout = 3, 8

    key = jax.random.PRNGKey(0)
    kx, ks, kc, kt = jax.random.split(key, 4)

    x = jax.random.normal(kx, (B, T, N, F), dtype=jnp.float32)
    satt = jax.random.normal(ks, (B, N, N), dtype=jnp.float32)
    cheb = jax.random.normal(kc, (B, K, N, N), dtype=jnp.float32)
    theta = xavier_uniform(kt, (K, F, Fout), gain=1.414)

    out = jax.block_until_ready(cheb_conv_with_sat_static(x, satt, cheb, theta))
    ref = jax.block_until_ready(_reference(x, satt, cheb, theta))

    assert out.shape == (B, T, N, Fout)
    assert jnp.allclose(out, ref, atol=1e-4, rtol=1e-4), "mismatch vs reference"

    print("KERNEL_OK")
</pallas_src>

<mosaic_0001>
module attributes {stable_mosaic.version = 11 : i64} {
  func.func @_cheb_conv_fused_kernel(%arg0: i32, %arg1: memref<1x48x16xf32, #tpu.memory_space<vmem>>, %arg2: memref<1x16x32xf32, #tpu.memory_space<vmem>>, %arg3: memref<3x32x64xf32, #tpu.memory_space<vmem>>, %arg4: memref<1x16x64xf32, #tpu.memory_space<vmem>>) attributes {dimension_semantics = [#tpu.dimension_semantics<parallel>], iteration_bounds = array<i64: 2>, scalar_prefetch = 0 : i64, scratch_operands = 0 : i64, tpu.core_type = #tpu.core_type<tc>, window_params = [{transform_indices = @transform_0, window_bounds = array<i64: 1, 48, 16>}, {transform_indices = @transform_1, window_bounds = array<i64: 1, 16, 32>}, {pipeline_mode = #tpu.pipeline_mode<synchronous>, transform_indices = @transform_2, window_bounds = array<i64: 3, 32, 64>}, {transform_indices = @transform_3, window_bounds = array<i64: 1, 16, 64>}]} {
    %c0 = arith.constant 0 : index
    %c0_0 = arith.constant 0 : index
    %c0_1 = arith.constant 0 : index
    %0 = vector.load %arg1[%c0, %c0_0, %c0_1] : memref<1x48x16xf32, #tpu.memory_space<vmem>>, vector<1x48x16xf32>
    %1 = vector.shape_cast %0 : vector<1x48x16xf32> to vector<48x16xf32>
    %c0_2 = arith.constant 0 : index
    %c0_3 = arith.constant 0 : index
    %c0_4 = arith.constant 0 : index
    %2 = vector.load %arg2[%c0_2, %c0_3, %c0_4] : memref<1x16x32xf32, #tpu.memory_space<vmem>>, vector<1x16x32xf32>
    %3 = vector.shape_cast %2 : vector<1x16x32xf32> to vector<16x32xf32>
    %cst = arith.constant dense<0.000000e+00> : vector<48x32xf32>
    %4 = tpu.matmul %1, %3, %cst {dimension_numbers = #tpu.dot_dimension_numbers<[1], [0], [0], [1], [0, 0, 1, 1], [], []>} : vector<48x16xf32>, vector<16x32xf32>, vector<48x32xf32> -> vector<48x32xf32>
    %5 = vector.extract_strided_slice %4 {offsets = [0, 0], sizes = [16, 32], strides = [1, 1]} : vector<48x32xf32> to vector<16x32xf32>
    %c0_5 = arith.constant 0 : index
    %c0_6 = arith.constant 0 : index
    %c0_7 = arith.constant 0 : index
    %6 = vector.load %arg3[%c0_5, %c0_6, %c0_7] : memref<3x32x64xf32, #tpu.memory_space<vmem>>, vector<1x32x64xf32>
    %7 = vector.shape_cast %6 : vector<1x32x64xf32> to vector<32x64xf32>
    %cst_8 = arith.constant dense<0.000000e+00> : vector<16x64xf32>
    %8 = tpu.matmul %5, %7, %cst_8 {dimension_numbers = #tpu.dot_dimension_numbers<[1], [0], [0], [1], [0, 0, 1, 1], [], []>} : vector<16x32xf32>, vector<32x64xf32>, vector<16x64xf32> -> vector<16x64xf32>
    %9 = vector.extract_strided_slice %4 {offsets = [16, 0], sizes = [16, 32], strides = [1, 1]} : vector<48x32xf32> to vector<16x32xf32>
    %c1 = arith.constant 1 : index
    %c0_9 = arith.constant 0 : index
    %c0_10 = arith.constant 0 : index
    %10 = vector.load %arg3[%c1, %c0_9, %c0_10] : memref<3x32x64xf32, #tpu.memory_space<vmem>>, vector<1x32x64xf32>
    %11 = vector.shape_cast %10 : vector<1x32x64xf32> to vector<32x64xf32>
    %cst_11 = arith.constant dense<0.000000e+00> : vector<16x64xf32>
    %12 = tpu.matmul %9, %11, %cst_11 {dimension_numbers = #tpu.dot_dimension_numbers<[1], [0], [0], [1], [0, 0, 1, 1], [], []>} : vector<16x32xf32>, vector<32x64xf32>, vector<16x64xf32> -> vector<16x64xf32>
    %13 = arith.addf %8, %12 : vector<16x64xf32>
    %14 = vector.extract_strided_slice %4 {offsets = [32, 0], sizes = [16, 32], strides = [1, 1]} : vector<48x32xf32> to vector<16x32xf32>
    %c2 = arith.constant 2 : index
    %c0_12 = arith.constant 0 : index
    %c0_13 = arith.constant 0 : index
    %15 = vector.load %arg3[%c2, %c0_12, %c0_13] : memref<3x32x64xf32, #tpu.memory_space<vmem>>, vector<1x32x64xf32>
    %16 = vector.shape_cast %15 : vector<1x32x64xf32> to vector<32x64xf32>
    %cst_14 = arith.constant dense<0.000000e+00> : vector<16x64xf32>
    %17 = tpu.matmul %14, %16, %cst_14 {dimension_numbers = #tpu.dot_dimension_numbers<[1], [0], [0], [1], [0, 0, 1, 1], [], []>} : vector<16x32xf32>, vector<32x64xf32>, vector<16x64xf32> -> vector<16x64xf32>
    %18 = arith.addf %13, %17 : vector<16x64xf32>
    %cst_15 = arith.constant 0.000000e+00 : f32
    %19 = vector.broadcast %cst_15 : f32 to vector<16x64xf32>
    %20 = arith.maximumf %18, %19 : vector<16x64xf32>
    %c0_16 = arith.constant 0 : index
    %c0_17 = arith.constant 0 : index
    %c0_18 = arith.constant 0 : index
    %21 = vector.load %arg4[%c0_16, %c0_17, %c0_18] : memref<1x16x64xf32, #tpu.memory_space<vmem>>, vector<1x16x64xf32>
    %22 = vector.shape_cast %21 : vector<1x16x64xf32> to vector<16x64xf32>
    %23 = vector.shape_cast %20 : vector<16x64xf32> to vector<1x16x64xf32>
    tpu.vector_store %arg4[%c0_16, %c0_17, %c0_18], %23 {strides = array<i32>} : memref<1x16x64xf32, #tpu.memory_space<vmem>>, vector<1x16x64xf32>,
    return
  }
  func.func @transform_0(%arg0: i32) -> (i32, i32, i32) {
    %c0_i32 = arith.constant 0 : i32
    %c0_i32_0 = arith.constant 0 : i32
    %c0_i32_1 = arith.constant 0 : i32
    return %arg0, %c0_i32, %c0_i32_0 : i32, i32, i32
  }
  func.func @transform_1(%arg0: i32) -> (i32, i32, i32) {
    %c0_i32 = arith.constant 0 : i32
    %c0_i32_0 = arith.constant 0 : i32
    %c0_i32_1 = arith.constant 0 : i32
    return %arg0, %c0_i32, %c0_i32_0 : i32, i32, i32
  }
  func.func @transform_2(%arg0: i32) -> (i32, i32, i32) {
    %c0_i32 = arith.constant 0 : i32
    %c0_i32_0 = arith.constant 0 : i32
    %c0_i32_1 = arith.constant 0 : i32
    %c0_i32_2 = arith.constant 0 : i32
    return %c0_i32, %c0_i32_0, %c0_i32_1 : i32, i32, i32
  }
  func.func @transform_3(%arg0: i32) -> (i32, i32, i32) {
    %c0_i32 = arith.constant 0 : i32
    %c0_i32_0 = arith.constant 0 : i32
    %c0_i32_1 = arith.constant 0 : i32
    return %arg0, %c0_i32, %c0_i32_0 : i32, i32, i32
  }
}

</mosaic_0001>

<bundles_post_ra>
// kernel: tpu_custom_call.1
= control target key start
LH: loop header
LB: loop body
LE: loop exit
PB: predicated region body
PF: predicated region fallthrough
CT: control target
= control target key end

     0   :  { %8 = vsyncpa [#allocation3], 0  ;;  %s1051_s0 = inlined_call_operand.vmem [shape: f32[2,48,16], index: 0, kind: input, shape index: {}]   ;;  %s1052_s1 = inlined_call_operand.vmem [shape: f32[2,16,32], index: 1, kind: input, shape index: {}]   ;;  %s1053_s2 = inlined_call_operand.vmem [shape: f32[3,32,64], index: 2, kind: input, shape index: {}]   ;;  %s1054_s3 = inlined_call_operand.hbm [shape: f32[2,16,64], index: 3, kind: output, shape index: {}]  }
   0x1   :  { %10 = vsyncpa [#allocation3 + $0x1], 0  ;;  %s898_s12 = smov 0   ;;  %s900_s13 = smov 0  }
   0x2   :  { %s902_s14 = smov 0   ;;  %s904_s15 = smov 0  }
   0x3 LB: > { %s919_s16 = sadd.s32 4294967295, %s873_s15   ;;  %s664_s17 = sadd.s32 4294967294, %s873_s15   ;;  %s873_s15 = sphi %s904_s15, %s1060_s15   ;;  %s869_s14 = sphi %s902_s14, %s1059_s14   ;;  %s865_s13 = sphi %s900_s13, %s1058_s13   ;;  %s861_s12 = sphi %s898_s12, %s1057_s12  }
   0x4   : > { %s923_s18 = sadd.s32 1, %s873_s15   ;;  %s96_s19 = sadd.s32 1, %s869_s14 }
   0x5   : > { %s93_s20 = ssub.s32 %s873_s15, %s923_s18  ;;  %p106_p0 = scmp.ne.s32.totalorder %s869_s14, %s865_s13 }
   0x6   : > { %p94_p1 = scmp.eq.s32.totalorder %s93_s20, 0  ;;  %p107_p2 = scmp.eq.s32.totalorder %s919_s16, 1 }
   0x7   : > { %p112_p3 = scmp.ne.s32.totalorder %s865_s13, %s861_s12  ;;  %p113_p4 = scmp.eq.s32.totalorder %s664_s17, 1 }
   0x8   : > { %s934_s21 = scalar_select %p94_p1, %s869_s14, %s96_s19  }
   0x9   : > { %p936_p5 = por %p107_p2, %p106_p0  ;;  %p940_p6 = por %p113_p4, %p112_p3 }
   0xa   : > { %p667_p7 = scmp.ge.s32.totalorder %s873_s15, 1  ;;  %p150_p8 = scmp.lt.s32.totalorder %s873_s15, 3 }
   0xc   : > { %p151_p9 = pnand %p667_p7, %p150_p8 }
   0xd   : > { %p179_p10 = scmp.lt.s32.totalorder (!%p151_p9), %s919_s16, 1  ;;  %s176_s17 = sand.u32 (!%p151_p9), 1, %s865_s13  }
   0xe   : > { %154 = sbr.rel (%p151_p9) target bundleno = 449 (0x1c1), region = 32  ;;  %s668_s19 = sshll.u32 (!%p151_p9), %s176_s17, 4 }
   0xf   : > { %s178_s20 = scalar_lea.vmem (!%p151_p9), [#allocation2], %s668_s19  ;;  %s698_s25 = sshll.u32 (!%p151_p9), %s919_s16, 8 }
  0x10   : > { %s590_s24 = sshll.u32 (!%p151_p9), %s178_s20, 4  ;;  %s1011_s29 = scalar_lea.sflag (!%p151_p9), [#allocation3], %s176_s17  ;;  %s1004_s24 = int_to_ptr.vmem [resolvable:$true] %s590_s24 }
  0x11   : > { %s875_s30 = smov (!%p151_p9), [#allocation2]  }
  0x13   : > { %v681_v0 = vld [vmem:[%s1053_s2 + $0x38] sm:$0xff]  ;;  %s180_s26 = scalar_select %p179_p10, %s919_s16, 1  ;;  %vm197_vm0 = vcmask 130048   ;;  %v313_v7 = vld [vmem:[%s1053_s2 + $0x10] sm:$0xff]  ;;  %v312_v11 = vld [vmem:[%s1053_s2 + $0x8] sm:$0xff]  ;;  %vm320_vm1 = vcmask 261120  }
  0x14   : > { %738 = vmatprep.subr.mxu1 %v681_v0  ;;  %v314_v5 = vld [vmem:[%s1053_s2 + $0x18] sm:$0xff]  ;;  %v680_v12 = vld [vmem:[%s1053_s2 + $0x30] sm:$0xff]  ;;  %v311_v13 = vld [vmem:[%s1053_s2] sm:$0xff]  ;;  %vm573_vm2 = vcmask 523264   ;;  %s813_s16 = scalar_lea.vmem %s1004_s24, 256 }
  0x15   : > { %739 = vmatpush3.msra.mxu1 %v681_v0  ;;  %s771_s27 = smul.u32 48, %s180_s26  ;;  %s697_s28 = sshll.u32 %s180_s26, 4  ;;  %v679_v14 = vld [vmem:[%s1053_s2 + $0x28] sm:$0xff]  ;;  %v678_v15 = vld [vmem:[%s1053_s2 + $0x20] sm:$0xff]  ;;  %v689_v16 = vld [vmem:[%s1053_s2 + $0x58] sm:$0xff] }
  0x16   : > { %s188_s4 = scalar_lea.vmem %s1052_s1, %s697_s28  ;;  %740 = vmatprep.subr.mxu1 %v680_v12  ;;  %v688_v21 = vld [vmem:[%s1053_s2 + $0x50] sm:$0xff]  ;;  %v687_v23 = vld [vmem:[%s1053_s2 + $0x48] sm:$0xff]  ;;  %v686_v25 = vld [vmem:[%s1053_s2 + $0x40] sm:$0xff]  ;;  %s1009_s28 = scalar_lea.hbm %s1054_s3, %s698_s25 }
  0x17   : > { %s183_s7 = scalar_lea.vmem %s1051_s0, %s771_s27  ;;  %v196_v1 = vld [vmem:[%s188_s4 + $0x8] sm:$0xff]  ;;  %v195_v2 = vld [vmem:[%s188_s4] sm:$0xff]  ;;  %741 = vmatpush3.msra.mxu1 %v680_v12  ;;  %p814_p11 = scmp.ne.s32.totalorder %s1004_s24, %s813_s16 }
  0x18   : > { %725 = vmatprep.subr.mxu0 %v196_v1  ;;  %v189_v3 = vld [vmem:[%s183_s7] sm:$0xff]  ;;  %v190_v4 = vld [vmem:[%s183_s7 + $0x8] sm:$0xff]  ;;  %v191_v6 = vld [vmem:[%s183_s7 + $0x10] sm:$0xff]  ;;  %742 = vmatprep.subr.mxu1 %v679_v14  ;;  %s817_s4 = sshll.u32 %s875_s30, 4  ;;  %s818_s4 = int_to_ptr.vmem [resolvable:$false] %s817_s4 }
  0x19   : > { %726 = vmatpush3.msra.mxu0 %v196_v1  ;;  %729 = vmatprep.mubr.msk.f32.mxu0 %vm197_vm0, %v189_v3  ;;  %v192_v8 = vld [vmem:[%s183_s7 + $0x18] sm:$0xff]  ;;  %v193_v9 = vld [vmem:[%s183_s7 + $0x20] sm:$0xff]  ;;  %v194_v10 = vld [vmem:[%s183_s7 + $0x28] sm:$0xff]  ;;  %p815_p12 = pnand %p814_p11, %p936_p5  ;;  %s819_s5 = scalar_lea.vmem %s818_s4, 512 }
  0x1a   : > { %727 = vmatprep.subr.mxu0 %v195_v2  ;;  %743 = vmatpush3.msra.mxu1 %v679_v14  ;;  %p820_p0 = scmp.lt.s32.totalorder %s1004_s24, %s818_s4  ;;  %p821_p1 = scmp.lt.s32.totalorder %s819_s5, %s813_s16 }
  0x1b   : > { %728 = vmatpush3.msra.mxu0 %v195_v2  ;;  %744 = vmatprep.subr.mxu1 %v678_v15  ;;  %p816_p13 = pneg %p815_p12 }
  0x1c   : > { %730 = vmatmul.mubr.msk.f32.vlgmr.msra.gmra.mxu0 %vm197_vm0, %v190_v4  ;;  %749 = vmatprep.subr.mxu0 %v314_v5  ;;  %p822_p2 = por %p821_p1, %p820_p0 }
  0x1d   : > { %732 = vmatprep.mubr.msk.f32.mxu0 %vm197_vm0, %v191_v6  ;;  %750 = vmatpush3.msra.mxu0 %v314_v5 }
  0x1e   : > { %751 = vmatprep.subr.mxu0 %v313_v7  ;;  %745 = vmatpush3.msra.mxu1 %v678_v15  ;;  %p823_p3 = pnand %p822_p2, %p816_p13 }
  0x1f   : > { %752 = vmatpush3.msra.mxu0 %v313_v7  ;;  %760 = vmatprep.subr.mxu1 %v689_v16 }
  0x20   : > { %733 = vmatmul.mubr.msk.f32.gmra.mxu0 %vm197_vm0, %v192_v8  ;;  %753 = vmatprep.subr.mxu0 %v312_v11 }
  0x21   : > { %735 = vmatprep.mubr.msk.f32.mxu0 %vm197_vm0, %v193_v9  ;;  %754 = vmatpush3.msra.mxu0 %v312_v11 }
  0x22   : > { %755 = vmatprep.subr.mxu0 %v311_v13 }
  0x23   : > { %756 = vmatpush3.msra.mxu0 %v311_v13 }
  0x24   : > { %736 = vmatmul.mubr.msk.f32.gmra.mxu0 %vm197_vm0, %v194_v10 }
  0xdc   : > { %v731_v17 = vpop.f32.mrf.mxu0 }
  0xde   : > { %v282_v18 = vpop.f32.mrf.mxu0 }
  0xdf   : > { %757 = vmatprep.mubr.msk.f32.mxu0 %vm320_vm1, %v282_v18 }
  0xe0   : > { %v734_v19 = vpop.f32.mrf.mxu0  ;;  %758 = vmatmul.mubr.msk.f32.vlgmr.msra.gmra.mxu0 %vm320_vm1, %v731_v17 }
  0xe2   : > { %v292_v20 = vpop.f32.mrf.mxu0 }
  0xe3   : > { %746 = vmatprep.mubr.msk.f32.mxu1 %vm320_vm1, %v292_v20 }
  0xe4   : > { %747 = vmatmul.mubr.msk.f32.vlgmr.msra.gmra.mxu1 %vm320_vm1, %v734_v19  ;;  %v737_v22 = vpop.f32.mrf.mxu0 }
  0xe5   : > { %761 = vmatpush3.msra.mxu1 %v689_v16 }
  0xe6   : > { %762 = vmatprep.subr.mxu1 %v688_v21  ;;  %v302_v24 = vpop.f32.mrf.mxu0 }
  0xe7   : > { %763 = vmatpush3.msra.mxu1 %v688_v21  ;;  %768 = vmatprep.mubr.msk.f32.mxu1 %vm320_vm1, %v302_v24 }
  0xe8   : > { %764 = vmatprep.subr.mxu1 %v687_v23 }
  0xe9   : > { %765 = vmatpush3.msra.mxu1 %v687_v23 }
  0xea   : > { %766 = vmatprep.subr.mxu1 %v686_v25 }
  0xeb   : > { %767 = vmatpush3.msra.mxu1 %v686_v25 }
  0xec   : > { %769 = vmatmul.mubr.msk.f32.vlgmr.msra.gmra.mxu1 %vm320_vm1, %v737_v22 }
 0x1a0   : > { %v759_v27 = vpop.f32.mrf.mxu0 }
 0x1a2   : > { %v474_v30 = vpop.f32.mrf.mxu0 }
 0x1a4   : > { %v748_v26 = vpop.f32.mrf.mxu1 }
 0x1a5   : > { %v480_v29 = vadd.f32 %v759_v27, %v748_v26 }
 0x1a6   : > { %v393_v28 = vpop.f32.mrf.mxu1 }
 0x1a7   : > { %v475_v32 = vadd.f32 %v474_v30, %v393_v28 }
 0x1ac   : > { %v770_v31 = vpop.f32.mrf.mxu1 }
 0x1ad   : > { %v570_v33 = vadd.f32 %v770_v31, %v480_v29 }
 0x1ae   : > { %v560_v34 = vpop.f32.mrf.mxu1 }
 0x1af   : > { %v572_v35 = vmax.f32 %v570_v33, 0.0  ;;  %v569_v36 = vadd.f32 %v560_v34, %v475_v32 }
 0x1b1   : > { %575 = vst.msk [vmem:[%s178_s20 + $0x8] sm:$0xff] %vm573_vm2, %v572_v35  ;;  %v571_v37 = vmax.f32 %v569_v36, 0.0 }
 0x1b3   : > { %574 = vst.msk [vmem:[%s178_s20] sm:$0xff] %vm573_vm2, %v571_v37 }
 0x1b4   : > { %826 = shalt.err (!%p823_p3)
}
 0x1b5   : > { %s827_s6 = scalar_lea.hbm %s1009_s28, 256  ;;  %s831_s9 = scalar_lea.hbm %s1054_s3, 512 }
 0x1b6   : > { %p828_p4 = scmp.ne.s32.totalorder %s1009_s28, %s827_s6  ;;  %p832_p9 = scmp.lt.s32.totalorder %s1009_s28, %s1054_s3 }
 0x1b7   : > { %p833_p10 = scmp.lt.s32.totalorder %s831_s9, %s827_s6 }
 0x1b8   : > { %p829_p7 = pnand %p828_p4, %p936_p5 }
 0x1b9   : > { %p834_p11 = por %p833_p10, %p832_p9 }
 0x1ba   : > { %p830_p8 = pneg %p829_p7 }
 0x1bc   : > { %p835_p12 = pnand %p834_p11, %p830_p8 }
 0x1be   : > { %838 = shalt.err (!%p835_p12)
}
 0x1bf   : > { %s876_s17 = smov 128   ;;  %s877_s19 = smov 8  }
 0x1c0   : > { %772 = dma.vmem_to_hbm [thread:$0]  (%p936_p5), %s1004_s24, 256, %s1009_s28, %s1011_s29, %s876_s17, %s876_s17, %s877_s19  }
 0x1c1 PF: > { %p778_p13 = scmp.ge.s32.totalorder %s873_s15, 2  ;;  %s605_s20 = sand.u32 1, %s861_s12  }
 0x1c2   : > { %s606_s25 = scalar_lea.sflag [#allocation3], %s605_s20 }
 0x1c3   : > { %p775_p0 = pnand %p778_p13, %p940_p6 }
 0x1c5   : > { %p776_p1 = pneg %p775_p0 }
 0x1c7   : > { %856 = dma.done.wait (%p776_p1), %s606_s25, 256  }
 0x1c8   : > { %858 = vsyncadd (%p776_p1), %s606_s25, 4294967040  ;;  %p13_p2 = scmp.ge.s32.totalorder %s923_s18, 4   ;;  %s1057_s12 = smov %s865_s13 }
 0x1c9   : > { %s1058_s13 = smov %s869_s14  ;;  %s1059_s14 = smov %s934_s21 }
 0x1ca   : > { %s1060_s15 = smov %s923_s18  ;;  %15 = sbr.rel (!%p13_p2) target bundleno = 3 (0x3), region = 72 }
 0x1cf   :  { %611 = vsyncpa [#allocation3], 1 }
 0x1d0   :  { %613 = vsyncpa [#allocation3 + $0x1], 1 }

</bundles_post_ra>
